<compile_context>
chip_gen: v6e
topology: v6e:2x2x1
jax: 0.10.0
libtpu: 0.0.40
codegen_flags: <defaults>
</compile_context>

<pallas_src>
import math

import jax
import jax.numpy as jnp
from jax.experimental import pallas as pl
from jax.experimental.pallas import tpu as pltpu

MAX_K = 3.0
_LANE = 128
_SUBLANE = 8
_TARGET_BLOCK_BYTES = 2 << 20      # ~2 MiB per x block
_VMEM_LIMIT_BYTES = 32 * 1024 * 1024


def _logistic_kernel(x_ref, steep_ref, x0_ref, o_ref):
    # x_ref/o_ref: (tb, tf) blocks; steep_ref/x0_ref: (1, tf), broadcast over tb.
    x = x_ref[...].astype(jnp.float32)
    o_ref[...] = jax.nn.sigmoid(steep_ref[...] * (x - x0_ref[...])).astype(o_ref.dtype)


def _tile_sizes(B, F_pad, itemsize):
    # Batch tile: full batch when it fits one packed sublane group; otherwise a
    # multiple of the dtype packing factor (8 rows f32, 16 bf16, 32 int8) so
    # sub-32-bit blocks fill vregs.  A ragged last batch block is masked by
    # Pallas automatically.
    pack = max(_SUBLANE, 32 // max(1, itemsize))
    tb = B if B <= pack else pack
    # Feature tile: multiple of 128 lanes targeting ~_TARGET_BLOCK_BYTES per
    # x block (F_pad is already a multiple of 128).
    max_f = max(_LANE, (_TARGET_BLOCK_BYTES // (tb * itemsize)) // _LANE * _LANE)
    tf = min(F_pad, max_f)
    return tb, tf


def logistic_layer(x, k, x_0, *, max_k=MAX_K):
    """x: (B, *shape); k, x_0: shape. Returns sigmoid(max_k*sigmoid(k)*(x-x_0))."""
    B = x.shape[0]
    feat_shape = tuple(x.shape[1:])
    assert tuple(k.shape) == feat_shape and tuple(x_0.shape) == feat_shape
    F = math.prod(feat_shape)

    # Hoist the parameter transform out of the kernel: the params are B x
    # smaller than x, so recomputing sigmoid(k) per batch block would waste
    # the EUP slot for no reason.
    steep = (max_k * jax.nn.sigmoid(k.astype(jnp.float32))).reshape(1, F)
    x0 = x_0.astype(jnp.float32).reshape(1, F)
    x2 = x.reshape(B, F)

    # Pad the feature dim up to a lane multiple so every block is lane-dense
    # (unmasked vst) and block sizing never degenerates to one full-F block.
    F_pad = pl.cdiv(F, _LANE) * _LANE
    if F_pad != F:
        pad = F_pad - F
        x2 = jnp.pad(x2, ((0, 0), (0, pad)))
        steep = jnp.pad(steep, ((0, 0), (0, pad)))
        x0 = jnp.pad(x0, ((0, 0), (0, pad)))

    itemsize = x2.dtype.itemsize
    tb, tf = _tile_sizes(B, F_pad, itemsize)

    # Feature axis OUTERMOST, batch axis innermost: steep/x0 keep a constant
    # block index across the inner batch sweep -> fetched once per feature
    # tile instead of once per (batch, feature) tile.
    grid = (pl.cdiv(F_pad, tf), pl.cdiv(B, tb))

    cost = pl.CostEstimate(
        flops=4 * B * F,
        transcendentals=B * F,
        bytes_accessed=2 * B * F * itemsize + 2 * F * 4,
    )

    out = pl.pallas_call(
        _logistic_kernel,
        out_shape=jax.ShapeDtypeStruct((B, F_pad), x.dtype),
        grid_spec=pltpu.PrefetchScalarGridSpec(
            num_scalar_prefetch=0,
            grid=grid,
            in_specs=[
                pl.BlockSpec((tb, tf), lambda j, i: (i, j)),
                pl.BlockSpec((1, tf), lambda j, i: (0, j)),
                pl.BlockSpec((1, tf), lambda j, i: (0, j)),
            ],
            out_specs=pl.BlockSpec((tb, tf), lambda j, i: (i, j)),
        ),
        compiler_params=pltpu.CompilerParams(
            dimension_semantics=("parallel", "parallel"),
            vmem_limit_bytes=_VMEM_LIMIT_BYTES,
        ),
        cost_estimate=cost,
    )(x2, steep, x0)

    if F_pad != F:
        out = out[:, :F]
    return out.reshape(x.shape)


def init_params(key, shape):
    """Deterministic init mirroring LogisticLayer.reset_parameters().

    kaiming_uniform_(k, a=sqrt(5)) on a 2D (S, H) tensor gives
      bound_k = sqrt(1 / fan_in) with fan_in = H,
    and x_0 ~ U(-1/sqrt(fan_in), 1/sqrt(fan_in)).
    """
    S, H = shape
    fan_in = H
    bound = 1.0 / math.sqrt(fan_in)
    k_key, x0_key = jax.random.split(key)
    k = jax.random.uniform(k_key, shape, jnp.float32, -bound, bound)
    x_0 = jax.random.uniform(x0_key, shape, jnp.float32, -bound, bound)
    return k, x_0


def _reference(x, k, x_0, max_k=MAX_K):
    return jax.nn.sigmoid(max_k * jax.nn.sigmoid(k)[None] * (x - x_0[None]))


if __name__ == "__main__":
    key = jax.random.PRNGKey(0)
    xkey, pkey, xkey2, pkey2 = jax.random.split(key, 4)

    # Lane-aligned case: batch=2, seq=8, hidden=32 (F = 256).
    B, S, H = 2, 8, 32
    x = jax.random.normal(xkey, (B, S, H), jnp.float32)
    k, x_0 = init_params(pkey, (S, H))

    out = logistic_layer(x, k, x_0)
    out = jax.block_until_ready(out)

    ref = _reference(x, k, x_0)
    assert out.shape == (B, S, H)
    assert jnp.allclose(out, ref, atol=1e-6, rtol=1e-6)

    # Unaligned feature size exercises the wrapper-side padding path (F = 60).
    S2, H2 = 3, 20
    x_u = jax.random.normal(xkey2, (B, S2, H2), jnp.float32)
    k_u, x0_u = init_params(pkey2, (S2, H2))
    out_u = jax.block_until_ready(logistic_layer(x_u, k_u, x0_u))
    assert out_u.shape == (B, S2, H2)
    assert jnp.allclose(out_u, _reference(x_u, k_u, x0_u), atol=1e-6, rtol=1e-6)

    print("KERNEL_OK")
</pallas_src>

<mosaic_0001>
module attributes {stable_mosaic.version = 11 : i64} {
  func.func @_logistic_kernel(%arg0: i32, %arg1: i32, %arg2: memref<2x256xf32, #tpu.memory_space<vmem>>, %arg3: memref<1x256xf32, #tpu.memory_space<vmem>>, %arg4: memref<1x256xf32, #tpu.memory_space<vmem>>, %arg5: memref<2x256xf32, #tpu.memory_space<vmem>>) attributes {dimension_semantics = [#tpu.dimension_semantics<parallel>, #tpu.dimension_semantics<parallel>], iteration_bounds = array<i64: 1, 1>, scalar_prefetch = 0 : i64, scratch_operands = 0 : i64, tpu.core_type = #tpu.core_type<tc>, window_params = [{transform_indices = @transform_0, window_bounds = array<i64: 2, 256>}, {transform_indices = @transform_1, window_bounds = array<i64: 1, 256>}, {transform_indices = @transform_2, window_bounds = array<i64: 1, 256>}, {transform_indices = @transform_3, window_bounds = array<i64: 2, 256>}]} {
    %c0 = arith.constant 0 : index
    %c0_0 = arith.constant 0 : index
    %0 = vector.load %arg2[%c0, %c0_0] : memref<2x256xf32, #tpu.memory_space<vmem>>, vector<2x256xf32>
    %c0_1 = arith.constant 0 : index
    %c0_2 = arith.constant 0 : index
    %1 = vector.load %arg3[%c0_1, %c0_2] : memref<1x256xf32, #tpu.memory_space<vmem>>, vector<1x256xf32>
    %c0_3 = arith.constant 0 : index
    %c0_4 = arith.constant 0 : index
    %2 = vector.load %arg4[%c0_3, %c0_4] : memref<1x256xf32, #tpu.memory_space<vmem>>, vector<1x256xf32>
    %3 = vector.broadcast %2 : vector<1x256xf32> to vector<2x256xf32>
    %4 = arith.subf %0, %3 : vector<2x256xf32>
    %5 = vector.broadcast %1 : vector<1x256xf32> to vector<2x256xf32>
    %6 = arith.mulf %5, %4 : vector<2x256xf32>
    %7 = arith.negf %6 : vector<2x256xf32>
    %8 = math.exp %7 : vector<2x256xf32>
    %cst = arith.constant 1.000000e+00 : f32
    %9 = vector.broadcast %cst : f32 to vector<2x256xf32>
    %10 = arith.addf %9, %8 : vector<2x256xf32>
    %11 = arith.divf %9, %10 : vector<2x256xf32>
    %c0_5 = arith.constant 0 : index
    %c0_6 = arith.constant 0 : index
    %12 = vector.load %arg5[%c0_5, %c0_6] : memref<2x256xf32, #tpu.memory_space<vmem>>, vector<2x256xf32>
    tpu.vector_store %arg5[%c0_5, %c0_6], %11 {strides = array<i32>} : memref<2x256xf32, #tpu.memory_space<vmem>>, vector<2x256xf32>,
    return
  }
  func.func @transform_0(%arg0: i32, %arg1: i32) -> (i32, i32) {
    %c0_i32 = arith.constant 0 : i32
    return %arg1, %arg0 : i32, i32
  }
  func.func @transform_1(%arg0: i32, %arg1: i32) -> (i32, i32) {
    %c0_i32 = arith.constant 0 : i32
    %c0_i32_0 = arith.constant 0 : i32
    return %c0_i32, %arg0 : i32, i32
  }
  func.func @transform_2(%arg0: i32, %arg1: i32) -> (i32, i32) {
    %c0_i32 = arith.constant 0 : i32
    %c0_i32_0 = arith.constant 0 : i32
    return %c0_i32, %arg0 : i32, i32
  }
  func.func @transform_3(%arg0: i32, %arg1: i32) -> (i32, i32) {
    %c0_i32 = arith.constant 0 : i32
    return %arg1, %arg0 : i32, i32
  }
}

</mosaic_0001>

<bundles_post_ra>
// kernel: tpu_custom_call.1
= control target key start
LH: loop header
LB: loop body
LE: loop exit
PB: predicated region body
PF: predicated region fallthrough
CT: control target
= control target key end

     0   :  { %8 = vsyncpa [#allocation3], 0  ;;  %s242_s0 = inlined_call_operand.hbm [shape: f32[2,256], index: 0, kind: input, shape index: {}]   ;;  %s243_s1 = inlined_call_operand.hbm [shape: f32[1,256], index: 1, kind: input, shape index: {}]   ;;  %s244_s2 = inlined_call_operand.vmem [shape: f32[1,256], index: 2, kind: input, shape index: {}]   ;;  %s245_s3 = inlined_call_operand.hbm [shape: f32[2,256], index: 3, kind: output, shape index: {}]  }
   0x1   :  { %9 = vsyncpa [#allocation6], 0 }
   0x2   :  { %10 = vsyncpa [#allocation4], 0  ;;  %s206_s12 = smov [#allocation2]   ;;  %s207_s14 = smov [#allocation5]  }
   0x3   :  { %s17_s13 = sshll.u32 %s206_s12, 4  ;;  %s27_s15 = sshll.u32 %s207_s14, 4  ;;  %s18_s13 = int_to_ptr.vmem [resolvable:$true] %s17_s13  ;;  %s28_s15 = int_to_ptr.vmem [resolvable:$true] %s27_s15 }
   0x4   :  { %s148_s16 = scalar_lea.vmem %s18_s13, 64  ;;  %p153_p1 = scmp.lt.s32.totalorder %s18_s13, %s18_s13 }
   0x5   :  { %p149_p0 = scmp.ne.s32.totalorder %s18_s13, %s148_s16  ;;  %p154_p2 = scmp.lt.s32.totalorder %s148_s16, %s148_s16 }
   0x7   :  { %p155_p3 = por %p154_p2, %p153_p1 }
   0x9   :  { %p156_p4 = pnand %p155_p3, %p149_p0 }
   0xb   :  { %159 = shalt.err (!%p156_p4)
}
   0xc   :  { %20 = dma.hbm_to_vmem [thread:$0]  %s242_s0, 64, %s18_s13, [#allocation3]  }
   0xd   :  { %s168_s19 = scalar_lea.vmem %s28_s15, 32  ;;  %p173_p6 = scmp.lt.s32.totalorder %s28_s15, %s28_s15 }
   0xe   :  { %p169_p5 = scmp.ne.s32.totalorder %s28_s15, %s168_s19  ;;  %p174_p7 = scmp.lt.s32.totalorder %s168_s19, %s168_s19 }
  0x10   :  { %p175_p8 = por %p174_p7, %p173_p6 }
  0x12   :  { %p176_p9 = pnand %p175_p8, %p169_p5 }
  0x14   :  { %179 = shalt.err (!%p176_p9)
}
  0x15   :  { %30 = dma.hbm_to_vmem [thread:$0]  %s243_s1, 32, %s28_s15, [#allocation6]  }
  0x16   :  { %200 = dma.done.wait [#allocation3], 64  }
  0x17   :  { %201 = vsyncadd [#allocation3], 4294967232 }
  0x18   :  { %202 = dma.done.wait [#allocation6], 32  }
  0x19   :  { %203 = vsyncadd [#allocation6], 4294967264  ;;  %v43_v0 = vlaneseq  ;;  %v208_v1 = vmov 1983009808   ;;  %v41_v7 = vld [vmem:[%s244_s2] sm:$0x3] }
  0x1a   :  { %v53_v2 = vunpack.c.l.s4 %v208_v1  ;;  %v39_v12 = vld [vmem:[#allocation2] sm:$0xf]  ;;  %v40_v13 = vld [vmem:[#allocation5] sm:$0x3]  ;;  %s209_s1 = smov [#allocation7]  }
  0x1b   :  { %v44_v3 = vshrl.u32 %v43_v0, 7  ;;  %s115_s2 = sshll.u32 %s209_s1, 4  ;;  %s116_s2 = int_to_ptr.vmem [resolvable:$true] %s115_s2 }
  0x1c   :  { %v54_v6 = vunpack.c.0.s8 %v53_v2  ;;  %s180_s23 = scalar_lea.vmem %s116_s2, 64  ;;  %p185_p11 = scmp.lt.s32.totalorder %s116_s2, %s116_s2 }
  0x1d   :  { %v45_v4 = vsub.s32 0, %v44_v3  ;;  %v49_v5 = vsub.s32 1, %v44_v3  ;;  %p181_p10 = scmp.ne.s32.totalorder %s116_s2, %s180_s23  ;;  %p186_p12 = scmp.lt.s32.totalorder %s180_s23, %s180_s23 }
  0x1e   :  { %v57_v10 = vsub.s32 %v54_v6, %v44_v3 }
  0x1f   :  { %v46_v8 = vrot.slane %v41_v7, %v45_v4  ;;  %v50_v9 = vrot.slane %v41_v7, %v49_v5  ;;  %v65_v16 = vrot.slane %v40_v13, %v45_v4  ;;  %v69_v17 = vrot.slane %v40_v13, %v49_v5  ;;  %p187_p13 = por %p186_p12, %p185_p11 }
  0x21   :  { %v51_v11 = vcombine.low %v46_v8, %v50_v9  ;;  %p188_p0 = pnand %p187_p13, %p181_p10 }
  0x23   :  { %v58_v14 = vrot.slane %v51_v11, %v57_v10 }
  0x25   :  { %v60_v15 = vsub.f32 %v39_v12, %v58_v14 }
  0x27   :  { %v79_v18 = vrot.slane %v60_v15, %v57_v10 }
  0x29   :  { %v80_v19 = vcombine.high %v79_v18, %v79_v18  ;;  %v83_v20 = vmul.f32 %v79_v18, %v65_v16 }
  0x2b   :  { %v84_v21 = vmul.f32 %v80_v19, %v69_v17  ;;  %v125_v22 = vmul.f32 -1.442695, %v83_v20 }
  0x2d   :  { %132 = vpow2.f32 %v125_v22  ;;  %v126_v23 = vmul.f32 -1.442695, %v84_v21 }
  0x2f   :  { %134 = vpow2.f32 %v126_v23 }
  0x3a   :  { %v133_v24 = vpop.eup %132 }
  0x3b   :  { %v91_v25 = vadd.f32 1.0, %v133_v24 }
  0x3c   :  { %v135_v26 = vpop.eup %134 }
  0x3d   :  { %v92_v27 = vadd.f32 1.0, %v135_v26  ;;  %136 = vrcp.f32 %v91_v25 }
  0x3f   :  { %138 = vrcp.f32 %v92_v27 }
  0x4a   :  { %v137_v28 = vpop.eup %136 }
  0x4c   :  { %v139_v29 = vpop.eup %138 }
  0x4d   :  { %v99_v30 = vcombine.low %v137_v28, %v139_v29 }
  0x4f   :  { %127 = vst.sshfl [vmem:[#allocation7] sm:$0x33 pattern:$0x76325410] %v99_v30 }
  0x50   :  { %191 = shalt.err (!%p188_p0)
}
  0x51   :  { %118 = dma.vmem_to_hbm [thread:$0]  %s116_s2, 64, %s245_s3, [#allocation4]  }
  0x52   :  { %204 = dma.done.wait [#allocation4], 64  }
  0x53   :  { %205 = vsyncadd [#allocation4], 4294967232 }
  0x54   :  { %122 = vsyncpa [#allocation3], 1 }
  0x55   :  { %123 = vsyncpa [#allocation6], 1 }
  0x56   :  { %124 = vsyncpa [#allocation4], 1 }

</bundles_post_ra>
